<compile_context>
chip_gen: v6e
topology: v6e:2x2x1
jax: 0.10.0
libtpu: 0.0.40
codegen_flags: <defaults>
</compile_context>

<pallas_src>
import functools

import jax
import jax.numpy as jnp
from jax.experimental import pallas as pl
from jax.experimental.pallas import tpu as pltpu


# ---------------------------------------------------------------------------
# Kernel
# ---------------------------------------------------------------------------
def generator_kernel(x_ref, w1_ref, b1_ref, w2_ref, b2_ref, w3_ref, b3_ref, o_ref):
    # fc1 + ReLU  (MXU in compute dtype, f32 accumulate, f32 epilogue)
    h1 = jnp.dot(x_ref[...], w1_ref[...], preferred_element_type=jnp.float32)
    h1 = jnp.maximum(h1 + b1_ref[...], 0.0)

    # fc2 + ReLU
    h2 = jnp.dot(h1.astype(w2_ref.dtype), w2_ref[...],
                 preferred_element_type=jnp.float32)
    h2 = jnp.maximum(h2 + b2_ref[...], 0.0)

    # fc3 + Tanh
    h3 = jnp.dot(h2.astype(w3_ref.dtype), w3_ref[...],
                 preferred_element_type=jnp.float32)
    o_ref[...] = jnp.tanh(h3 + b3_ref[...]).astype(o_ref.dtype)


# ---------------------------------------------------------------------------
# Host-side wrapper: padding, tiling, pallas_call
# ---------------------------------------------------------------------------
_LANE = 128   # lane width (last dim)
_SUB = 8      # sublane width (second-to-last dim)


def _round_up(n, m):
    return ((n + m - 1) // m) * m


def _pad_to(a, shape):
    pads = [(0, t - s) for s, t in zip(a.shape, shape)]
    if any(p[1] for p in pads):
        return jnp.pad(a, pads)
    return a


@functools.partial(jax.jit, static_argnames=("block_batch", "compute_dtype"))
def generator_forward(x, w1, b1, w2, b2, w3, b3,
                      *, block_batch=512, compute_dtype=jnp.bfloat16):
    """Fused 3-layer MLP forward: tanh(relu(relu(x@W1+b1)@W2+b2)@W3+b3)."""
    B, in_size = x.shape
    hidden = w1.shape[1]
    out_size = w3.shape[1]

    # Lane-dense padded feature dims (multiples of 128), sublane-aligned batch.
    in_p = _round_up(in_size, _LANE)
    hid_p = _round_up(hidden, _LANE)
    out_p = _round_up(out_size, _LANE)

    tb = min(block_batch, _round_up(B, _SUB))   # rows per grid step
    Bp = _round_up(B, tb)                       # padded batch

    # Zero-padding is semantics-preserving: padded hidden channels see zero
    # weights and zero bias -> ReLU(0)=0 -> contribute nothing downstream;
    # padded batch rows / output columns are sliced off at the end.
    xp = _pad_to(x, (Bp, in_p)).astype(compute_dtype)
    w1p = _pad_to(w1, (in_p, hid_p)).astype(compute_dtype)
    w2p = _pad_to(w2, (hid_p, hid_p)).astype(compute_dtype)
    w3p = _pad_to(w3, (hid_p, out_p)).astype(compute_dtype)
    b1p = _pad_to(b1, (1, hid_p)).astype(jnp.float32)
    b2p = _pad_to(b2, (1, hid_p)).astype(jnp.float32)
    b3p = _pad_to(b3, (1, out_p)).astype(jnp.float32)

    grid = (Bp // tb,)

    itemsize = jnp.dtype(compute_dtype).itemsize
    flops = 2 * B * (in_size * hidden + hidden * hidden + hidden * out_size)
    bytes_accessed = (
        Bp * in_p * itemsize                                   # x
        + (in_p * hid_p + hid_p * hid_p + hid_p * out_p) * itemsize  # weights
        + (2 * hid_p + out_p) * 4                              # biases (f32)
        + Bp * out_p * 4                                       # output (f32)
    )

    out_padded = pl.pallas_call(
        generator_kernel,
        out_shape=jax.ShapeDtypeStruct((Bp, out_p), jnp.float32),
        grid=grid,
        in_specs=[
            pl.BlockSpec((tb, in_p), lambda i: (i, 0)),     # x: tiled over batch
            pl.BlockSpec((in_p, hid_p), lambda i: (0, 0)),  # W1: grid-invariant
            pl.BlockSpec((1, hid_p), lambda i: (0, 0)),     # b1
            pl.BlockSpec((hid_p, hid_p), lambda i: (0, 0)),  # W2
            pl.BlockSpec((1, hid_p), lambda i: (0, 0)),     # b2
            pl.BlockSpec((hid_p, out_p), lambda i: (0, 0)),  # W3
            pl.BlockSpec((1, out_p), lambda i: (0, 0)),     # b3
        ],
        out_specs=pl.BlockSpec((tb, out_p), lambda i: (i, 0)),
        compiler_params=pltpu.CompilerParams(
            dimension_semantics=("parallel",),   # shard batch across TCs (v7x)
        ),
        cost_estimate=pl.CostEstimate(
            flops=flops,
            transcendentals=B * out_size,        # tanh
            bytes_accessed=bytes_accessed,
        ),
    )(xp, w1p, b1p, w2p, b2p, w3p, b3p)

    return out_padded[:B, :out_size]


# ---------------------------------------------------------------------------
# Init + demo
# ---------------------------------------------------------------------------
def init_linear(key, in_features, out_features):
    """Deterministic init matching nn.Linear's U(-1/sqrt(in), 1/sqrt(in)).
    Weight is stored as (in_features, out_features) = PyTorch weight.T."""
    kw, kb = jax.random.split(key)
    bound = 1.0 / jnp.sqrt(in_features)
    w = jax.random.uniform(kw, (in_features, out_features), jnp.float32, -bound, bound)
    b = jax.random.uniform(kb, (1, out_features), jnp.float32, -bound, bound)
    return w, b


if __name__ == "__main__":
    # Small shapes consistent with the module's forward. Batch is a multiple of
    # 8 sublanes; the wrapper pads features to lane width and tiles the batch.
    batch = 64
    input_size = 16
    hidden_size = 32
    output_size = 16

    key = jax.random.PRNGKey(0)
    kx, k1, k2, k3 = jax.random.split(key, 4)

    x = jax.random.normal(kx, (batch, input_size), dtype=jnp.float32)
    w1, b1 = init_linear(k1, input_size, hidden_size)
    w2, b2 = init_linear(k2, hidden_size, hidden_size)
    w3, b3 = init_linear(k3, hidden_size, output_size)

    out = generator_forward(x, w1, b1, w2, b2, w3, b3)
    out = jax.block_until_ready(out)

    # Reference in plain f32 JAX (same math as the PyTorch forward).
    ref = jnp.maximum(x @ w1 + b1, 0.0)
    ref = jnp.maximum(ref @ w2 + b2, 0.0)
    ref = jnp.tanh(ref @ w3 + b3)

    assert out.shape == (batch, output_size)
    # bf16 MXU operands -> loose-but-meaningful tolerance vs. f32 reference.
    assert jnp.allclose(out, ref, atol=3e-2), "mismatch vs reference"

    print("KERNEL_OK")
</pallas_src>

<mosaic_0001>
module attributes {stable_mosaic.version = 11 : i64} {
  func.func @generator_kernel(%arg0: i32, %arg1: memref<64x128xbf16, #tpu.memory_space<vmem>>, %arg2: memref<128x128xbf16, #tpu.memory_space<vmem>>, %arg3: memref<1x128xf32, #tpu.memory_space<vmem>>, %arg4: memref<128x128xbf16, #tpu.memory_space<vmem>>, %arg5: memref<1x128xf32, #tpu.memory_space<vmem>>, %arg6: memref<128x128xbf16, #tpu.memory_space<vmem>>, %arg7: memref<1x128xf32, #tpu.memory_space<vmem>>, %arg8: memref<64x128xf32, #tpu.memory_space<vmem>>) attributes {dimension_semantics = [#tpu.dimension_semantics<parallel>], iteration_bounds = array<i64: 1>, scalar_prefetch = 0 : i64, scratch_operands = 0 : i64, tpu.core_type = #tpu.core_type<tc>, window_params = [{transform_indices = @transform_0, window_bounds = array<i64: 64, 128>}, {pipeline_mode = #tpu.pipeline_mode<synchronous>, transform_indices = @transform_1, window_bounds = array<i64: 128, 128>}, {pipeline_mode = #tpu.pipeline_mode<synchronous>, transform_indices = @transform_2, window_bounds = array<i64: 1, 128>}, {pipeline_mode = #tpu.pipeline_mode<synchronous>, transform_indices = @transform_3, window_bounds = array<i64: 128, 128>}, {pipeline_mode = #tpu.pipeline_mode<synchronous>, transform_indices = @transform_4, window_bounds = array<i64: 1, 128>}, {pipeline_mode = #tpu.pipeline_mode<synchronous>, transform_indices = @transform_5, window_bounds = array<i64: 128, 128>}, {pipeline_mode = #tpu.pipeline_mode<synchronous>, transform_indices = @transform_6, window_bounds = array<i64: 1, 128>}, {transform_indices = @transform_7, window_bounds = array<i64: 64, 128>}]} {
    %c0 = arith.constant 0 : index
    %c0_0 = arith.constant 0 : index
    %0 = vector.load %arg1[%c0, %c0_0] : memref<64x128xbf16, #tpu.memory_space<vmem>>, vector<64x128xbf16>
    %c0_1 = arith.constant 0 : index
    %c0_2 = arith.constant 0 : index
    %1 = vector.load %arg2[%c0_1, %c0_2] : memref<128x128xbf16, #tpu.memory_space<vmem>>, vector<128x128xbf16>
    %cst = arith.constant dense<0.000000e+00> : vector<64x128xf32>
    %2 = tpu.matmul %0, %1, %cst {dimension_numbers = #tpu.dot_dimension_numbers<[1], [0], [0], [1], [0, 0, 1, 1], [], []>} : vector<64x128xbf16>, vector<128x128xbf16>, vector<64x128xf32> -> vector<64x128xf32>
    %c0_3 = arith.constant 0 : index
    %c0_4 = arith.constant 0 : index
    %3 = vector.load %arg3[%c0_3, %c0_4] : memref<1x128xf32, #tpu.memory_space<vmem>>, vector<1x128xf32>
    %4 = vector.broadcast %3 : vector<1x128xf32> to vector<64x128xf32>
    %5 = arith.addf %2, %4 : vector<64x128xf32>
    %cst_5 = arith.constant 0.000000e+00 : f32
    %6 = vector.broadcast %cst_5 : f32 to vector<64x128xf32>
    %7 = arith.maximumf %5, %6 : vector<64x128xf32>
    %8 = arith.truncf %7 : vector<64x128xf32> to vector<64x128xbf16>
    %c0_6 = arith.constant 0 : index
    %c0_7 = arith.constant 0 : index
    %9 = vector.load %arg4[%c0_6, %c0_7] : memref<128x128xbf16, #tpu.memory_space<vmem>>, vector<128x128xbf16>
    %cst_8 = arith.constant dense<0.000000e+00> : vector<64x128xf32>
    %10 = tpu.matmul %8, %9, %cst_8 {dimension_numbers = #tpu.dot_dimension_numbers<[1], [0], [0], [1], [0, 0, 1, 1], [], []>} : vector<64x128xbf16>, vector<128x128xbf16>, vector<64x128xf32> -> vector<64x128xf32>
    %c0_9 = arith.constant 0 : index
    %c0_10 = arith.constant 0 : index
    %11 = vector.load %arg5[%c0_9, %c0_10] : memref<1x128xf32, #tpu.memory_space<vmem>>, vector<1x128xf32>
    %12 = vector.broadcast %11 : vector<1x128xf32> to vector<64x128xf32>
    %13 = arith.addf %10, %12 : vector<64x128xf32>
    %cst_11 = arith.constant 0.000000e+00 : f32
    %14 = vector.broadcast %cst_11 : f32 to vector<64x128xf32>
    %15 = arith.maximumf %13, %14 : vector<64x128xf32>
    %16 = arith.truncf %15 : vector<64x128xf32> to vector<64x128xbf16>
    %c0_12 = arith.constant 0 : index
    %c0_13 = arith.constant 0 : index
    %17 = vector.load %arg6[%c0_12, %c0_13] : memref<128x128xbf16, #tpu.memory_space<vmem>>, vector<128x128xbf16>
    %cst_14 = arith.constant dense<0.000000e+00> : vector<64x128xf32>
    %18 = tpu.matmul %16, %17, %cst_14 {dimension_numbers = #tpu.dot_dimension_numbers<[1], [0], [0], [1], [0, 0, 1, 1], [], []>} : vector<64x128xbf16>, vector<128x128xbf16>, vector<64x128xf32> -> vector<64x128xf32>
    %c0_15 = arith.constant 0 : index
    %c0_16 = arith.constant 0 : index
    %19 = vector.load %arg7[%c0_15, %c0_16] : memref<1x128xf32, #tpu.memory_space<vmem>>, vector<1x128xf32>
    %20 = vector.broadcast %19 : vector<1x128xf32> to vector<64x128xf32>
    %21 = arith.addf %18, %20 : vector<64x128xf32>
    %22 = math.tanh %21 : vector<64x128xf32>
    %c0_17 = arith.constant 0 : index
    %c0_18 = arith.constant 0 : index
    %23 = vector.load %arg8[%c0_17, %c0_18] : memref<64x128xf32, #tpu.memory_space<vmem>>, vector<64x128xf32>
    tpu.vector_store %arg8[%c0_17, %c0_18], %22 {strides = array<i32>} : memref<64x128xf32, #tpu.memory_space<vmem>>, vector<64x128xf32>,
    return
  }
  func.func @transform_0(%arg0: i32) -> (i32, i32) {
    %c0_i32 = arith.constant 0 : i32
    %c0_i32_0 = arith.constant 0 : i32
    return %arg0, %c0_i32 : i32, i32
  }
  func.func @transform_1(%arg0: i32) -> (i32, i32) {
    %c0_i32 = arith.constant 0 : i32
    %c0_i32_0 = arith.constant 0 : i32
    %c0_i32_1 = arith.constant 0 : i32
    return %c0_i32, %c0_i32_0 : i32, i32
  }
  func.func @transform_2(%arg0: i32) -> (i32, i32) {
    %c0_i32 = arith.constant 0 : i32
    %c0_i32_0 = arith.constant 0 : i32
    %c0_i32_1 = arith.constant 0 : i32
    return %c0_i32, %c0_i32_0 : i32, i32
  }
  func.func @transform_3(%arg0: i32) -> (i32, i32) {
    %c0_i32 = arith.constant 0 : i32
    %c0_i32_0 = arith.constant 0 : i32
    %c0_i32_1 = arith.constant 0 : i32
    return %c0_i32, %c0_i32_0 : i32, i32
  }
  func.func @transform_4(%arg0: i32) -> (i32, i32) {
    %c0_i32 = arith.constant 0 : i32
    %c0_i32_0 = arith.constant 0 : i32
    %c0_i32_1 = arith.constant 0 : i32
    return %c0_i32, %c0_i32_0 : i32, i32
  }
  func.func @transform_5(%arg0: i32) -> (i32, i32) {
    %c0_i32 = arith.constant 0 : i32
    %c0_i32_0 = arith.constant 0 : i32
    %c0_i32_1 = arith.constant 0 : i32
    return %c0_i32, %c0_i32_0 : i32, i32
  }
  func.func @transform_6(%arg0: i32) -> (i32, i32) {
    %c0_i32 = arith.constant 0 : i32
    %c0_i32_0 = arith.constant 0 : i32
    %c0_i32_1 = arith.constant 0 : i32
    return %c0_i32, %c0_i32_0 : i32, i32
  }
  func.func @transform_7(%arg0: i32) -> (i32, i32) {
    %c0_i32 = arith.constant 0 : i32
    %c0_i32_0 = arith.constant 0 : i32
    return %arg0, %c0_i32 : i32, i32
  }
}

</mosaic_0001>

<bundles_post_ra>
// kernel: generator_forward.1
= control target key start
LH: loop header
LB: loop body
LE: loop exit
PB: predicated region body
PF: predicated region fallthrough
CT: control target
= control target key end

     0   :  { %s867_s1 = inlined_call_operand.vmem [shape: bf16[128,128], index: 1, kind: input, shape index: {}]   ;;  %s868_s0 = inlined_call_operand.vmem [shape: bf16[64,128], index: 0, kind: input, shape index: {}]   ;;  %s869_s3 = inlined_call_operand.vmem [shape: bf16[128,128], index: 3, kind: input, shape index: {}]   ;;  %s870_s5 = inlined_call_operand.vmem [shape: bf16[128,128], index: 5, kind: input, shape index: {}]   ;;  %s871_s2 = inlined_call_operand.vmem [shape: f32[1,128], index: 2, kind: input, shape index: {}]   ;;  %s872_s4 = inlined_call_operand.vmem [shape: f32[1,128], index: 4, kind: input, shape index: {}]   ;;  %s873_s6 = inlined_call_operand.vmem [shape: f32[1,128], index: 6, kind: input, shape index: {}]   ;;  %s874_s7 = inlined_call_operand.vmem [shape: f32[64,128], index: 7, kind: output, shape index: {}]  }
   0x1   :  { %v666_v0 = vld [vmem:[%s867_s1 + $0x38] sm:$0xff]   ;;  %v667_v1 = vld [vmem:[%s867_s1 + $0x30] sm:$0xff]   ;;  %v668_v2 = vld [vmem:[%s867_s1 + $0x28] sm:$0xff]  }
   0x2   :  { %578 = vmatprep.subr.bf16.mxu0 %v666_v0  ;;  %v669_v3 = vld [vmem:[%s867_s1 + $0x20] sm:$0xff]   ;;  %v670_v5 = vld [vmem:[%s867_s1 + $0x18] sm:$0xff]   ;;  %v679_v7 = vld [vmem:[%s869_s3 + $0x30] sm:$0xff]  }
   0x3   :  { %579 = vmatpush3.bf16.msra.mxu0 %v666_v0  ;;  %v674_v4 = vld [vmem:[%s868_s0] sm:$0xff]   ;;  %v678_v6 = vld [vmem:[%s869_s3 + $0x38] sm:$0xff]   ;;  %v671_v8 = vld [vmem:[%s867_s1 + $0x10] sm:$0xff]  }
   0x4   :  { %580 = vmatprep.subr.bf16.mxu0 %v667_v1  ;;  %594 = vmatprep.mubr.bf16.mxu0 %v674_v4  ;;  %v680_v9 = vld [vmem:[%s869_s3 + $0x28] sm:$0xff]   ;;  %v681_v11 = vld [vmem:[%s869_s3 + $0x20] sm:$0xff]   ;;  %v682_v13 = vld [vmem:[%s869_s3 + $0x18] sm:$0xff]  }
   0x5   :  { %602 = vmatprep.subr.bf16.mxu1 %v678_v6  ;;  %v672_v10 = vld [vmem:[%s867_s1 + $0x8] sm:$0xff]   ;;  %v673_v12 = vld [vmem:[%s867_s1] sm:$0xff]   ;;  %v676_v15 = vld [vmem:[%s868_s0 + $0x10] sm:$0xff]  }
   0x6   :  { %603 = vmatpush3.bf16.msra.mxu1 %v678_v6  ;;  %v675_v14 = vld [vmem:[%s868_s0 + $0x8] sm:$0xff]   ;;  %v677_v16 = vld [vmem:[%s868_s0 + $0x18] sm:$0xff]   ;;  %v683_v17 = vld [vmem:[%s869_s3 + $0x10] sm:$0xff]  }
   0x7   :  { %581 = vmatpush3.bf16.msra.mxu0 %v667_v1  ;;  %604 = vmatprep.subr.bf16.mxu1 %v679_v7  ;;  %v684_v18 = vld [vmem:[%s869_s3 + $0x8] sm:$0xff]   ;;  %v685_v19 = vld [vmem:[%s869_s3] sm:$0xff]   ;;  %v686_v20 = vld [vmem:[%s870_s5 + $0x38] sm:$0xff]  }
   0x8   :  { %582 = vmatprep.subr.bf16.mxu0 %v668_v2  ;;  %v687_v21 = vld [vmem:[%s870_s5 + $0x30] sm:$0xff]   ;;  %v688_v22 = vld [vmem:[%s870_s5 + $0x28] sm:$0xff]   ;;  %v689_v23 = vld [vmem:[%s870_s5 + $0x20] sm:$0xff]  }
   0x9   :  { %v690_v24 = vld [vmem:[%s870_s5 + $0x18] sm:$0xff]   ;;  %v511_v27 = vld [vmem:[%s871_s2] ss:$0 sm:$0xff]  ;;  %v691_v54 = vld [vmem:[%s870_s5 + $0x10] sm:$0xff]  }
   0xa   :  { %605 = vmatpush3.bf16.msra.mxu1 %v679_v7  ;;  %v692_v55 = vld [vmem:[%s870_s5 + $0x8] sm:$0xff]   ;;  %v693_v56 = vld [vmem:[%s870_s5] sm:$0xff]  }
   0xb   :  { %583 = vmatpush3.bf16.msra.mxu0 %v668_v2  ;;  %606 = vmatprep.subr.bf16.mxu1 %v680_v9  ;;  %v524_v59 = vld [vmem:[%s872_s4] ss:$0 sm:$0xff] }
   0xc   :  { %584 = vmatprep.subr.bf16.mxu0 %v669_v3 }
   0xe   :  { %607 = vmatpush3.bf16.msra.mxu1 %v680_v9 }
   0xf   :  { %585 = vmatpush3.bf16.msra.mxu0 %v669_v3  ;;  %608 = vmatprep.subr.bf16.mxu1 %v681_v11 }
  0x10   :  { %586 = vmatprep.subr.bf16.mxu0 %v670_v5 }
  0x12   :  { %609 = vmatpush3.bf16.msra.mxu1 %v681_v11 }
  0x13   :  { %587 = vmatpush3.bf16.msra.mxu0 %v670_v5  ;;  %610 = vmatprep.subr.bf16.mxu1 %v682_v13 }
  0x14   :  { %588 = vmatprep.subr.bf16.mxu0 %v671_v8 }
  0x16   :  { %611 = vmatpush3.bf16.msra.mxu1 %v682_v13 }
  0x17   :  { %589 = vmatpush3.bf16.msra.mxu0 %v671_v8  ;;  %612 = vmatprep.subr.bf16.mxu1 %v683_v17 }
  0x18   :  { %590 = vmatprep.subr.bf16.mxu0 %v672_v10 }
  0x1a   :  { %613 = vmatpush3.bf16.msra.mxu1 %v683_v17 }
  0x1b   :  { %591 = vmatpush3.bf16.msra.mxu0 %v672_v10  ;;  %614 = vmatprep.subr.bf16.mxu1 %v684_v18 }
  0x1c   :  { %592 = vmatprep.subr.bf16.mxu0 %v673_v12 }
  0x1e   :  { %615 = vmatpush3.bf16.msra.mxu1 %v684_v18 }
  0x1f   :  { %593 = vmatpush3.bf16.msra.mxu0 %v673_v12  ;;  %616 = vmatprep.subr.bf16.mxu1 %v685_v19 }
  0x20   :  { %626 = vmatprep.subr.bf16.mxu0 %v686_v20 }
  0x22   :  { %595 = vmatmul.mubr.bf16.vlgmr.msra.gmra.mxu0 %v675_v14  ;;  %617 = vmatpush3.bf16.msra.mxu1 %v685_v19 }
  0x23   :  { %598 = vmatprep.mubr.bf16.mxu0 %v676_v15  ;;  %650 = vmatprep.subr.bf16.mxu1 %v686_v20 }
  0x24   :  { %627 = vmatpush3.bf16.msra.mxu0 %v686_v20 }
  0x25   :  { %628 = vmatprep.subr.bf16.mxu0 %v687_v21 }
  0x28   :  { %629 = vmatpush3.bf16.msra.mxu0 %v687_v21 }
  0x29   :  { %630 = vmatprep.subr.bf16.mxu0 %v688_v22 }
  0x2a   :  { %599 = vmatmul.mubr.bf16.gmra.mxu0 %v677_v16 }
  0x2c   :  { %631 = vmatpush3.bf16.msra.mxu0 %v688_v22 }
  0x2d   :  { %632 = vmatprep.subr.bf16.mxu0 %v689_v23 }
  0x30   :  { %633 = vmatpush3.bf16.msra.mxu0 %v689_v23 }
  0x31   :  { %634 = vmatprep.subr.bf16.mxu0 %v690_v24 }
  0x34   :  { %635 = vmatpush3.bf16.msra.mxu0 %v690_v24 }
  0x35   :  { %636 = vmatprep.subr.bf16.mxu0 %v691_v54 }
  0x38   :  { %637 = vmatpush3.bf16.msra.mxu0 %v691_v54 }
  0x39   :  { %638 = vmatprep.subr.bf16.mxu0 %v692_v55 }
  0x3c   :  { %639 = vmatpush3.bf16.msra.mxu0 %v692_v55 }
  0x3d   :  { %640 = vmatprep.subr.bf16.mxu0 %v693_v56 }
  0x40   :  { %641 = vmatpush3.bf16.msra.mxu0 %v693_v56 }
  0xe2   :  { %v596_v25 = vpop.f32.mrf.mxu0 }
  0xe3   :  { %v173_v31 = vadd.f32 %v596_v25, %v511_v27 }
  0xe4   :  { %v164_v26 = vpop.f32.mrf.mxu0 }
  0xe5   :  { %v165_v29 = vadd.f32 %v511_v27, %v164_v26  ;;  %v197_v38 = vmax.f32 %v173_v31, 0.0 }
  0xe6   :  { %v597_v28 = vpop.f32.mrf.mxu0 }
  0xe7   :  { %v176_v30 = vadd.f32 %v597_v28, %v511_v27  ;;  %v195_v36 = vmax.f32 %v165_v29, 0.0 }
  0xe8   :  { %v167_v32 = vpop.f32.mrf.mxu0 }
  0xe9   :  { %v168_v33 = vadd.f32 %v511_v27, %v167_v32  ;;  %v198_v34 = vmax.f32 %v176_v30, 0.0 }
  0xea   :  { %v600_v35 = vpop.f32.mrf.mxu0 }
  0xeb   :  { %v196_v37 = vmax.f32 %v168_v33, 0.0  ;;  %v204_v41 = vpack.c.bf16 %v198_v34, %v197_v38  ;;  %v189_v45 = vadd.f32 %v600_v35, %v511_v27 }
  0xec   :  { %v180_v39 = vpop.f32.mrf.mxu0 }
  0xed   :  { %v203_v40 = vpack.c.bf16 %v196_v37, %v195_v36  ;;  %v181_v43 = vadd.f32 %v511_v27, %v180_v39  ;;  %v201_v51 = vmax.f32 %v189_v45, 0.0 }
  0xee   :  { %v601_v42 = vpop.f32.mrf.mxu0 }
  0xef   :  { %v192_v44 = vadd.f32 %v601_v42, %v511_v27  ;;  %618 = vmatprep.mubr.bf16.mxu1 %v203_v40  ;;  %v199_v49 = vmax.f32 %v181_v43, 0.0 }
  0xf0   :  { %v183_v46 = vpop.f32.mrf.mxu0  ;;  %619 = vmatmul.mubr.bf16.vlgmr.msra.gmra.mxu1 %v204_v41 }
  0xf1   :  { %v184_v47 = vadd.f32 %v511_v27, %v183_v46  ;;  %658 = vmatpush3.bf16.msra.mxu1 %v686_v20  ;;  %v202_v48 = vmax.f32 %v192_v44, 0.0 }
  0xf2   :  { %651 = vmatprep.subr.bf16.mxu1 %v687_v21 }
  0xf3   :  { %v200_v50 = vmax.f32 %v184_v47, 0.0  ;;  %v206_v53 = vpack.c.bf16 %v202_v48, %v201_v51 }
  0xf5   :  { %v205_v52 = vpack.c.bf16 %v200_v50, %v199_v49  ;;  %659 = vmatpush3.bf16.msra.mxu1 %v687_v21 }
  0xf6   :  { %652 = vmatprep.subr.bf16.mxu1 %v688_v22 }
  0xf7   :  { %622 = vmatprep.mubr.bf16.mxu1 %v205_v52 }
  0xf8   :  { %623 = vmatmul.mubr.bf16.gmra.mxu1 %v206_v53 }
  0xf9   :  { %660 = vmatpush3.bf16.msra.mxu1 %v688_v22  ;;  %v533_v22 = vld [vmem:[%s873_s6] ss:$0 sm:$0xff] }
  0xfa   :  { %653 = vmatprep.subr.bf16.mxu1 %v689_v23 }
  0xfd   :  { %661 = vmatpush3.bf16.msra.mxu1 %v689_v23 }
  0xfe   :  { %654 = vmatprep.subr.bf16.mxu1 %v690_v24 }
 0x101   :  { %662 = vmatpush3.bf16.msra.mxu1 %v690_v24 }
 0x102   :  { %655 = vmatprep.subr.bf16.mxu1 %v691_v54 }
 0x105   :  { %663 = vmatpush3.bf16.msra.mxu1 %v691_v54 }
 0x106   :  { %656 = vmatprep.subr.bf16.mxu1 %v692_v55 }
 0x109   :  { %664 = vmatpush3.bf16.msra.mxu1 %v692_v55 }
 0x10a   :  { %657 = vmatprep.subr.bf16.mxu1 %v693_v56 }
 0x10d   :  { %665 = vmatpush3.bf16.msra.mxu1 %v693_v56 }
 0x1b0   :  { %v620_v57 = vpop.f32.mrf.mxu1 }
 0x1b1   :  { %v321_v63 = vadd.f32 %v620_v57, %v524_v59 }
 0x1b2   :  { %v312_v58 = vpop.f32.mrf.mxu1 }
 0x1b3   :  { %v313_v61 = vadd.f32 %v524_v59, %v312_v58  ;;  %v345_v6 = vmax.f32 %v321_v63, 0.0 }
 0x1b4   :  { %v621_v60 = vpop.f32.mrf.mxu1 }
 0x1b5   :  { %v324_v62 = vadd.f32 %v621_v60, %v524_v59  ;;  %v343_v4 = vmax.f32 %v313_v61, 0.0 }
 0x1b6   :  { %v315_v0 = vpop.f32.mrf.mxu1 }
 0x1b7   :  { %v316_v1 = vadd.f32 %v524_v59, %v315_v0  ;;  %v346_v2 = vmax.f32 %v324_v62, 0.0 }
 0x1b8   :  { %v624_v3 = vpop.f32.mrf.mxu1 }
 0x1b9   :  { %v344_v5 = vmax.f32 %v316_v1, 0.0  ;;  %v352_v9 = vpack.c.bf16 %v346_v2, %v345_v6  ;;  %v337_v13 = vadd.f32 %v624_v3, %v524_v59 }
 0x1ba   :  { %v328_v7 = vpop.f32.mrf.mxu1 }
 0x1bb   :  { %v351_v8 = vpack.c.bf16 %v344_v5, %v343_v4  ;;  %v329_v11 = vadd.f32 %v524_v59, %v328_v7  ;;  %v349_v19 = vmax.f32 %v337_v13, 0.0 }
 0x1bc   :  { %v625_v10 = vpop.f32.mrf.mxu1 }
 0x1bd   :  { %v340_v12 = vadd.f32 %v625_v10, %v524_v59  ;;  %642 = vmatprep.mubr.bf16.mxu0 %v351_v8  ;;  %v347_v17 = vmax.f32 %v329_v11, 0.0 }
 0x1be   :  { %v331_v14 = vpop.f32.mrf.mxu1  ;;  %643 = vmatmul.mubr.bf16.vlgmr.msra.gmra.mxu0 %v352_v9 }
 0x1bf   :  { %v332_v15 = vadd.f32 %v524_v59, %v331_v14  ;;  %v350_v16 = vmax.f32 %v340_v12, 0.0 }
 0x1c1   :  { %v348_v18 = vmax.f32 %v332_v15, 0.0  ;;  %v354_v21 = vpack.c.bf16 %v350_v16, %v349_v19 }
 0x1c3   :  { %v353_v20 = vpack.c.bf16 %v348_v18, %v347_v17 }
 0x1c5   :  { %646 = vmatprep.mubr.bf16.mxu1 %v353_v20 }
 0x1c6   :  { %647 = vmatmul.mubr.bf16.vlgmr.msra.gmra.mxu1 %v354_v21 }
 0x27e   :  { %v644_v23 = vpop.f32.mrf.mxu0 }
 0x27f   :  { %v469_v24 = vadd.f32 %v644_v23, %v533_v22 }
 0x280   :  { %v460_v25 = vpop.f32.mrf.mxu0 }
 0x281   :  { %694 = vtanh.f32 %v469_v24  ;;  %v461_v26 = vadd.f32 %v533_v22, %v460_v25 }
 0x282   :  { %v645_v27 = vpop.f32.mrf.mxu0 }
 0x283   :  { %696 = vtanh.f32 %v461_v26  ;;  %v472_v28 = vadd.f32 %v645_v27, %v533_v22 }
 0x284   :  { %v463_v29 = vpop.f32.mrf.mxu0 }
 0x285   :  { %698 = vtanh.f32 %v472_v28  ;;  %v464_v30 = vadd.f32 %v533_v22, %v463_v29 }
 0x286   :  { %v648_v31 = vpop.f32.mrf.mxu1 }
 0x287   :  { %700 = vtanh.f32 %v464_v30  ;;  %v485_v32 = vadd.f32 %v648_v31, %v533_v22 }
 0x288   :  { %v476_v33 = vpop.f32.mrf.mxu1 }
 0x289   :  { %702 = vtanh.f32 %v485_v32  ;;  %v477_v34 = vadd.f32 %v533_v22, %v476_v33 }
 0x28a   :  { %v649_v35 = vpop.f32.mrf.mxu1 }
 0x28b   :  { %704 = vtanh.f32 %v477_v34  ;;  %v488_v36 = vadd.f32 %v649_v35, %v533_v22 }
 0x28c   :  { %v479_v37 = vpop.f32.mrf.mxu1 }
 0x28d   :  { %706 = vtanh.f32 %v488_v36  ;;  %v480_v38 = vadd.f32 %v533_v22, %v479_v37 }
 0x28e   :  { %v695_v39 = vpop.eup %694 }
 0x28f   :  { %501 = vst [vmem:[%s874_s7 + $0x10] sm:$0xff] %v695_v39  ;;  %708 = vtanh.f32 %v480_v38 }
 0x290   :  { %v697_v40 = vpop.eup %696 }
 0x291   :  { %499 = vst [vmem:[%s874_s7] sm:$0xff] %v697_v40 }
 0x292   :  { %v699_v41 = vpop.eup %698 }
 0x293   :  { %502 = vst [vmem:[%s874_s7 + $0x18] sm:$0xff] %v699_v41 }
 0x294   :  { %v701_v42 = vpop.eup %700 }
 0x295   :  { %500 = vst [vmem:[%s874_s7 + $0x8] sm:$0xff] %v701_v42 }
 0x296   :  { %v703_v43 = vpop.eup %702 }
 0x297   :  { %505 = vst [vmem:[%s874_s7 + $0x30] sm:$0xff] %v703_v43 }
 0x298   :  { %v705_v44 = vpop.eup %704 }
 0x299   :  { %503 = vst [vmem:[%s874_s7 + $0x20] sm:$0xff] %v705_v44 }
 0x29a   :  { %v707_v45 = vpop.eup %706 }
 0x29b   :  { %506 = vst [vmem:[%s874_s7 + $0x38] sm:$0xff] %v707_v45 }
 0x29c   :  { %v709_v46 = vpop.eup %708 }
 0x29d   :  { %504 = vst [vmem:[%s874_s7 + $0x28] sm:$0xff] %v709_v46 }

</bundles_post_ra>
